<compile_context>
chip_gen: v7x
topology: tpu7x:2x2x1
jax: 0.10.0
libtpu: 0.0.40
codegen_flags: <defaults>
</compile_context>

<pallas_src>
import jax
import jax.numpy as jnp
from jax.experimental import pallas as pl
from jax.experimental.pallas import tpu as pltpu

IN_PAD = 8     # input features  5 -> 8   (sublane-aligned K for the first dot)
HID_PAD = 128  # hidden width   25 -> 128 (lane-aligned)
OUT_PAD = 8    # output width    2 -> 8   (narrow writeback: 32 B/row, not 512)


def _round_up(n, m):
    return ((n + m - 1) // m) * m


def _cdiv(a, b):
    return (a + b - 1) // b


def _pad2(a, shape):
    """Zero-pad a 2-D array up to `shape` (top-left corner holds the data)."""
    out = jnp.zeros(shape, a.dtype)
    return out.at[: a.shape[0], : a.shape[1]].set(a)


def mlp_kernel(x_ref, w1_ref, b1_ref, w2_ref, b2_ref,
               w3_ref, b3_ref, w4_ref, b4_ref, o_ref):
    # Four chained MXU matmuls with f32 accumulation; bias add + ReLU on the
    # VPU in f32 (v5e has no bf16 VPU path, so f32 elementwise is portable).
    h = jnp.dot(x_ref[...], w1_ref[...], preferred_element_type=jnp.float32)
    h = jnp.maximum(h + b1_ref[...], 0.0)

    h = jnp.dot(h.astype(w2_ref.dtype), w2_ref[...],
                preferred_element_type=jnp.float32)
    h = jnp.maximum(h + b2_ref[...], 0.0)

    h = jnp.dot(h.astype(w3_ref.dtype), w3_ref[...],
                preferred_element_type=jnp.float32)
    h = jnp.maximum(h + b3_ref[...], 0.0)

    h = jnp.dot(h.astype(w4_ref.dtype), w4_ref[...],
                preferred_element_type=jnp.float32)
    o_ref[...] = (h + b4_ref[...]).astype(o_ref.dtype)


def mlp_forward(x, params, *, block_rows=8192, use_bf16=True):
    """x: (B, 5) float32; params: dict with w1..w4 (in,out) and b1..b4 (1,out)."""
    B, in_dim = x.shape
    hid = params["w1"].shape[1]
    out_dim = params["w4"].shape[1]

    # ---- batch tiling --------------------------------------------------------
    # Balanced tiles (last tile isn't mostly padding); force >= 2 grid steps when
    # the batch allows it so "parallel" shards across v7x's two TensorCores.
    n_tiles = _cdiv(B, block_rows)
    if B >= 16 and n_tiles < 2:
        n_tiles = 2
    TB = _round_up(_cdiv(B, n_tiles), 8)
    grid_n = _cdiv(B, TB)
    B_pad = grid_n * TB

    compute_dtype = jnp.bfloat16 if use_bf16 else jnp.float32
    in_itemsize = jnp.dtype(compute_dtype).itemsize

    # ---- lane/sublane-aligned, zero-padded operands (pads contribute 0) ------
    xp = _pad2(x, (B_pad, IN_PAD)).astype(compute_dtype)
    w1 = _pad2(params["w1"], (IN_PAD, HID_PAD)).astype(compute_dtype)
    w2 = _pad2(params["w2"], (HID_PAD, HID_PAD)).astype(compute_dtype)
    w3 = _pad2(params["w3"], (HID_PAD, HID_PAD)).astype(compute_dtype)
    w4 = _pad2(params["w4"], (HID_PAD, OUT_PAD)).astype(compute_dtype)
    b1 = _pad2(params["b1"], (1, HID_PAD))   # biases stay f32 (f32 VPU add/ReLU)
    b2 = _pad2(params["b2"], (1, HID_PAD))
    b3 = _pad2(params["b3"], (1, HID_PAD))
    b4 = _pad2(params["b4"], (1, OUT_PAD))

    # x / out march over the batch grid; weights & biases pinned to block (0, 0)
    # so Pallas fetches them once and they stay VMEM-resident across the grid.
    x_spec = pl.BlockSpec((TB, IN_PAD), lambda i: (i, 0))
    o_spec = pl.BlockSpec((TB, OUT_PAD), lambda i: (i, 0))

    def resident(shape):
        return pl.BlockSpec(shape, lambda i: (0, 0))

    # ---- explicit VMEM budget (double-buffered x/out + params, 2x margin) ----
    weight_bytes = (w1.size + w2.size + w3.size + w4.size) * in_itemsize
    bias_bytes = (b1.size + b2.size + b3.size + b4.size) * 4
    vmem_needed = (2 * TB * IN_PAD * in_itemsize      # x, double buffered
                   + 2 * TB * OUT_PAD * 4             # out, double buffered
                   + 2 * (weight_bytes + bias_bytes)) # params, worst case 2x
    vmem_limit = int(min(max(2 * vmem_needed, 16 << 20), 48 << 20))

    # ---- cost estimate: logical flops, real bytes moved ----------------------
    flops = 2 * B * (in_dim * hid + 2 * hid * hid + hid * out_dim)
    bytes_accessed = (xp.size * in_itemsize
                      + weight_bytes + bias_bytes
                      + B_pad * OUT_PAD * 4)

    out_pad_arr = pl.pallas_call(
        mlp_kernel,
        out_shape=jax.ShapeDtypeStruct((B_pad, OUT_PAD), jnp.float32),
        grid=(grid_n,),
        in_specs=[
            x_spec,
            resident((IN_PAD, HID_PAD)), resident((1, HID_PAD)),
            resident((HID_PAD, HID_PAD)), resident((1, HID_PAD)),
            resident((HID_PAD, HID_PAD)), resident((1, HID_PAD)),
            resident((HID_PAD, OUT_PAD)), resident((1, OUT_PAD)),
        ],
        out_specs=o_spec,
        compiler_params=pltpu.CompilerParams(
            dimension_semantics=("parallel",),
            vmem_limit_bytes=vmem_limit),
        cost_estimate=pl.CostEstimate(
            flops=flops, transcendentals=0, bytes_accessed=bytes_accessed),
    )(xp, w1, b1, w2, b2, w3, b3, w4, b4)

    # Slice the padded slab back to the logical (B, out_dim) output.
    return out_pad_arr[:B, :out_dim]


def init_params(key):
    """Deterministic init mirroring PyTorch Linear default U(-1/sqrt(fan_in), +...)."""
    dims = [(5, 25), (25, 25), (25, 25), (25, 2)]
    params = {}
    keys = jax.random.split(key, 2 * len(dims))
    for i, (fan_in, fan_out) in enumerate(dims):
        bound = 1.0 / jnp.sqrt(fan_in)
        w = jax.random.uniform(keys[2 * i], (fan_in, fan_out),
                               minval=-bound, maxval=bound, dtype=jnp.float32)
        b = jax.random.uniform(keys[2 * i + 1], (1, fan_out),
                               minval=-bound, maxval=bound, dtype=jnp.float32)
        params[f"w{i + 1}"] = w
        params[f"b{i + 1}"] = b
    return params


def reference_forward(x, params):
    h = jnp.maximum(x @ params["w1"] + params["b1"], 0.0)
    h = jnp.maximum(h @ params["w2"] + params["b2"], 0.0)
    h = jnp.maximum(h @ params["w3"] + params["b3"], 0.0)
    return h @ params["w4"] + params["b4"]


if __name__ == "__main__":
    key = jax.random.PRNGKey(0)
    pkey, k1, k2, k3 = jax.random.split(key, 4)
    params = init_params(pkey)

    # 1) Small batch, exact-f32 path (single grid step): tight tolerance.
    x = jax.random.normal(k1, (8, 5), dtype=jnp.float32)
    out = jax.block_until_ready(mlp_forward(x, params, use_bf16=False))
    ref = reference_forward(x, params)
    assert out.shape == (8, 2), out.shape
    assert jnp.allclose(out, ref, atol=1e-5, rtol=1e-5), "f32 mismatch vs reference"

    # 2) Default (bf16 operands, f32 accumulation) across 3 balanced tiles.
    x2 = jax.random.normal(k2, (24, 5), dtype=jnp.float32)
    out2 = jax.block_until_ready(mlp_forward(x2, params, block_rows=8))
    ref2 = reference_forward(x2, params)
    assert out2.shape == (24, 2), out2.shape
    assert jnp.allclose(out2, ref2, atol=5e-2, rtol=5e-2), "bf16 mismatch (tiled)"

    # 3) Forced 2-step grid (v7x megacore split path) with default block_rows.
    x3 = jax.random.normal(k3, (32, 5), dtype=jnp.float32)
    out3 = jax.block_until_ready(mlp_forward(x3, params))
    ref3 = reference_forward(x3, params)
    assert out3.shape == (32, 2), out3.shape
    assert jnp.allclose(out3, ref3, atol=5e-2, rtol=5e-2), "bf16 mismatch (2-tile)"

    print("KERNEL_OK")
</pallas_src>

<mosaic_0001>
module attributes {stable_mosaic.version = 11 : i64} {
  func.func @mlp_kernel(%arg0: i32, %arg1: memref<8x8xf32, #tpu.memory_space<vmem>>, %arg2: memref<8x128xf32, #tpu.memory_space<vmem>>, %arg3: memref<1x128xf32, #tpu.memory_space<vmem>>, %arg4: memref<128x128xf32, #tpu.memory_space<vmem>>, %arg5: memref<1x128xf32, #tpu.memory_space<vmem>>, %arg6: memref<128x128xf32, #tpu.memory_space<vmem>>, %arg7: memref<1x128xf32, #tpu.memory_space<vmem>>, %arg8: memref<128x8xf32, #tpu.memory_space<vmem>>, %arg9: memref<1x8xf32, #tpu.memory_space<vmem>>, %arg10: memref<8x8xf32, #tpu.memory_space<vmem>>) attributes {dimension_semantics = [#tpu.dimension_semantics<parallel>], iteration_bounds = array<i64: 1>, scalar_prefetch = 0 : i64, scratch_operands = 0 : i64, tpu.core_type = #tpu.core_type<tc>, window_params = [{transform_indices = @transform_0, window_bounds = array<i64: 8, 8>}, {pipeline_mode = #tpu.pipeline_mode<synchronous>, transform_indices = @transform_1, window_bounds = array<i64: 8, 128>}, {pipeline_mode = #tpu.pipeline_mode<synchronous>, transform_indices = @transform_2, window_bounds = array<i64: 1, 128>}, {pipeline_mode = #tpu.pipeline_mode<synchronous>, transform_indices = @transform_3, window_bounds = array<i64: 128, 128>}, {pipeline_mode = #tpu.pipeline_mode<synchronous>, transform_indices = @transform_4, window_bounds = array<i64: 1, 128>}, {pipeline_mode = #tpu.pipeline_mode<synchronous>, transform_indices = @transform_5, window_bounds = array<i64: 128, 128>}, {pipeline_mode = #tpu.pipeline_mode<synchronous>, transform_indices = @transform_6, window_bounds = array<i64: 1, 128>}, {pipeline_mode = #tpu.pipeline_mode<synchronous>, transform_indices = @transform_7, window_bounds = array<i64: 128, 8>}, {pipeline_mode = #tpu.pipeline_mode<synchronous>, transform_indices = @transform_8, window_bounds = array<i64: 1, 8>}, {transform_indices = @transform_9, window_bounds = array<i64: 8, 8>}]} {
    %c0 = arith.constant 0 : index
    %c0_0 = arith.constant 0 : index
    %0 = vector.load %arg1[%c0, %c0_0] : memref<8x8xf32, #tpu.memory_space<vmem>>, vector<8x8xf32>
    %c0_1 = arith.constant 0 : index
    %c0_2 = arith.constant 0 : index
    %1 = vector.load %arg2[%c0_1, %c0_2] : memref<8x128xf32, #tpu.memory_space<vmem>>, vector<8x128xf32>
    %cst = arith.constant dense<0.000000e+00> : vector<8x128xf32>
    %2 = tpu.matmul %0, %1, %cst {dimension_numbers = #tpu.dot_dimension_numbers<[1], [0], [0], [1], [0, 0, 1, 1], [], []>} : vector<8x8xf32>, vector<8x128xf32>, vector<8x128xf32> -> vector<8x128xf32>
    %c0_3 = arith.constant 0 : index
    %c0_4 = arith.constant 0 : index
    %3 = vector.load %arg3[%c0_3, %c0_4] : memref<1x128xf32, #tpu.memory_space<vmem>>, vector<1x128xf32>
    %4 = vector.broadcast %3 : vector<1x128xf32> to vector<8x128xf32>
    %5 = arith.addf %2, %4 : vector<8x128xf32>
    %cst_5 = arith.constant 0.000000e+00 : f32
    %6 = vector.broadcast %cst_5 : f32 to vector<8x128xf32>
    %7 = arith.maximumf %5, %6 : vector<8x128xf32>
    %c0_6 = arith.constant 0 : index
    %c0_7 = arith.constant 0 : index
    %8 = vector.load %arg4[%c0_6, %c0_7] : memref<128x128xf32, #tpu.memory_space<vmem>>, vector<128x128xf32>
    %cst_8 = arith.constant dense<0.000000e+00> : vector<8x128xf32>
    %9 = tpu.matmul %7, %8, %cst_8 {dimension_numbers = #tpu.dot_dimension_numbers<[1], [0], [0], [1], [0, 0, 1, 1], [], []>} : vector<8x128xf32>, vector<128x128xf32>, vector<8x128xf32> -> vector<8x128xf32>
    %c0_9 = arith.constant 0 : index
    %c0_10 = arith.constant 0 : index
    %10 = vector.load %arg5[%c0_9, %c0_10] : memref<1x128xf32, #tpu.memory_space<vmem>>, vector<1x128xf32>
    %11 = vector.broadcast %10 : vector<1x128xf32> to vector<8x128xf32>
    %12 = arith.addf %9, %11 : vector<8x128xf32>
    %cst_11 = arith.constant 0.000000e+00 : f32
    %13 = vector.broadcast %cst_11 : f32 to vector<8x128xf32>
    %14 = arith.maximumf %12, %13 : vector<8x128xf32>
    %c0_12 = arith.constant 0 : index
    %c0_13 = arith.constant 0 : index
    %15 = vector.load %arg6[%c0_12, %c0_13] : memref<128x128xf32, #tpu.memory_space<vmem>>, vector<128x128xf32>
    %cst_14 = arith.constant dense<0.000000e+00> : vector<8x128xf32>
    %16 = tpu.matmul %14, %15, %cst_14 {dimension_numbers = #tpu.dot_dimension_numbers<[1], [0], [0], [1], [0, 0, 1, 1], [], []>} : vector<8x128xf32>, vector<128x128xf32>, vector<8x128xf32> -> vector<8x128xf32>
    %c0_15 = arith.constant 0 : index
    %c0_16 = arith.constant 0 : index
    %17 = vector.load %arg7[%c0_15, %c0_16] : memref<1x128xf32, #tpu.memory_space<vmem>>, vector<1x128xf32>
    %18 = vector.broadcast %17 : vector<1x128xf32> to vector<8x128xf32>
    %19 = arith.addf %16, %18 : vector<8x128xf32>
    %cst_17 = arith.constant 0.000000e+00 : f32
    %20 = vector.broadcast %cst_17 : f32 to vector<8x128xf32>
    %21 = arith.maximumf %19, %20 : vector<8x128xf32>
    %c0_18 = arith.constant 0 : index
    %c0_19 = arith.constant 0 : index
    %22 = vector.load %arg8[%c0_18, %c0_19] : memref<128x8xf32, #tpu.memory_space<vmem>>, vector<128x8xf32>
    %cst_20 = arith.constant dense<0.000000e+00> : vector<8x8xf32>
    %23 = tpu.matmul %21, %22, %cst_20 {dimension_numbers = #tpu.dot_dimension_numbers<[1], [0], [0], [1], [0, 0, 1, 1], [], []>} : vector<8x128xf32>, vector<128x8xf32>, vector<8x8xf32> -> vector<8x8xf32>
    %c0_21 = arith.constant 0 : index
    %c0_22 = arith.constant 0 : index
    %24 = vector.load %arg9[%c0_21, %c0_22] : memref<1x8xf32, #tpu.memory_space<vmem>>, vector<1x8xf32>
    %25 = vector.broadcast %24 : vector<1x8xf32> to vector<8x8xf32>
    %26 = arith.addf %23, %25 : vector<8x8xf32>
    %c0_23 = arith.constant 0 : index
    %c0_24 = arith.constant 0 : index
    %27 = vector.load %arg10[%c0_23, %c0_24] : memref<8x8xf32, #tpu.memory_space<vmem>>, vector<8x8xf32>
    tpu.vector_store %arg10[%c0_23, %c0_24], %26 {strides = array<i32>} : memref<8x8xf32, #tpu.memory_space<vmem>>, vector<8x8xf32>,
    return
  }
  func.func @transform_0(%arg0: i32) -> (i32, i32) {
    %c0_i32 = arith.constant 0 : i32
    %c0_i32_0 = arith.constant 0 : i32
    return %arg0, %c0_i32 : i32, i32
  }
  func.func @transform_1(%arg0: i32) -> (i32, i32) {
    %c0_i32 = arith.constant 0 : i32
    %c0_i32_0 = arith.constant 0 : i32
    %c0_i32_1 = arith.constant 0 : i32
    return %c0_i32, %c0_i32_0 : i32, i32
  }
  func.func @transform_2(%arg0: i32) -> (i32, i32) {
    %c0_i32 = arith.constant 0 : i32
    %c0_i32_0 = arith.constant 0 : i32
    %c0_i32_1 = arith.constant 0 : i32
    return %c0_i32, %c0_i32_0 : i32, i32
  }
  func.func @transform_3(%arg0: i32) -> (i32, i32) {
    %c0_i32 = arith.constant 0 : i32
    %c0_i32_0 = arith.constant 0 : i32
    %c0_i32_1 = arith.constant 0 : i32
    return %c0_i32, %c0_i32_0 : i32, i32
  }
  func.func @transform_4(%arg0: i32) -> (i32, i32) {
    %c0_i32 = arith.constant 0 : i32
    %c0_i32_0 = arith.constant 0 : i32
    %c0_i32_1 = arith.constant 0 : i32
    return %c0_i32, %c0_i32_0 : i32, i32
  }
  func.func @transform_5(%arg0: i32) -> (i32, i32) {
    %c0_i32 = arith.constant 0 : i32
    %c0_i32_0 = arith.constant 0 : i32
    %c0_i32_1 = arith.constant 0 : i32
    return %c0_i32, %c0_i32_0 : i32, i32
  }
  func.func @transform_6(%arg0: i32) -> (i32, i32) {
    %c0_i32 = arith.constant 0 : i32
    %c0_i32_0 = arith.constant 0 : i32
    %c0_i32_1 = arith.constant 0 : i32
    return %c0_i32, %c0_i32_0 : i32, i32
  }
  func.func @transform_7(%arg0: i32) -> (i32, i32) {
    %c0_i32 = arith.constant 0 : i32
    %c0_i32_0 = arith.constant 0 : i32
    %c0_i32_1 = arith.constant 0 : i32
    return %c0_i32, %c0_i32_0 : i32, i32
  }
  func.func @transform_8(%arg0: i32) -> (i32, i32) {
    %c0_i32 = arith.constant 0 : i32
    %c0_i32_0 = arith.constant 0 : i32
    %c0_i32_1 = arith.constant 0 : i32
    return %c0_i32, %c0_i32_0 : i32, i32
  }
  func.func @transform_9(%arg0: i32) -> (i32, i32) {
    %c0_i32 = arith.constant 0 : i32
    %c0_i32_0 = arith.constant 0 : i32
    return %arg0, %c0_i32 : i32, i32
  }
}

</mosaic_0001>

<bundles_post_ra>
// kernel: tpu_custom_call.1
= control target key start
LH: loop header
LB: loop body
LE: loop exit
PB: predicated region body
PF: predicated region fallthrough
CT: control target
= control target key end

     0   :  { %14 = vsyncpa [#allocation3], 0  ;;  %s1008_s0 = inlined_call_operand.vmem [shape: f32[8,8], index: 0, kind: input, shape index: {}]   ;;  %s1009_s1 = inlined_call_operand.hbm [shape: f32[8,128], index: 1, kind: input, shape index: {}]   ;;  %s1010_s2 = inlined_call_operand.vmem [shape: f32[1,128], index: 2, kind: input, shape index: {}]   ;;  %s1011_s3 = inlined_call_operand.vmem [shape: f32[128,128], index: 3, kind: input, shape index: {}]   ;;  %s1012_s4 = inlined_call_operand.vmem [shape: f32[1,128], index: 4, kind: input, shape index: {}]   ;;  %s1013_s5 = inlined_call_operand.hbm [shape: f32[128,128], index: 5, kind: input, shape index: {}]   ;;  %s1014_s6 = inlined_call_operand.vmem [shape: f32[1,128], index: 6, kind: input, shape index: {}]   ;;  %s1015_s7 = inlined_call_operand.vmem [shape: f32[128,8], index: 7, kind: input, shape index: {}]   ;;  %s1016_s8 = inlined_call_operand.vmem [shape: f32[1,8], index: 8, kind: input, shape index: {}]   ;;  %s1017_s9 = inlined_call_operand.hbm [shape: f32[8,8], index: 9, kind: output, shape index: {}]  }
   0x1   :  { %15 = vsyncpa [#allocation6], 0 }
   0x2   :  { %16 = vsyncpa [#allocation4], 0  ;;  %s761_s30 = smov [#allocation2]   ;;  %s762_s11 = smov [#allocation5]  }
   0x3   :  { %s25_s10 = sshll.u32 %s761_s30, 4  ;;  %s40_s12 = sshll.u32 %s762_s11, 4  ;;  %s26_s10 = int_to_ptr.vmem [resolvable:$true] %s25_s10  ;;  %s819_s12 = int_to_ptr.vmem [resolvable:$true] %s40_s12 }
   0x4   :  { %s689_s15 = scalar_lea.hbm %s1009_s1, 128 }
   0x5   :  { %p690_p0 = scmp.ne.s32.totalorder %s1009_s1, %s689_s15  ;;  %p693_p1 = scmp.lt.u32.totalorder %s689_s15, %s1009_s1 }
   0x7   :  { %p695_p2 = pnand %p693_p1, %p690_p0 }
   0x9   :  { %698 = shalt.err (!%p695_p2)
}
   0xa   :  { %s699_s20 = scalar_lea.vmem %s26_s10, 128  ;;  %p704_p4 = scmp.lt.s32.totalorder %s26_s10, %s26_s10 }
   0xb   :  { %p700_p3 = scmp.ne.s32.totalorder %s26_s10, %s699_s20  ;;  %p705_p5 = scmp.lt.s32.totalorder %s699_s20, %s699_s20 }
   0xd   :  { %p706_p6 = por %p705_p5, %p704_p4 }
   0xf   :  { %p707_p7 = pnand %p706_p6, %p700_p3 }
  0x11   :  { %710 = shalt.err (!%p707_p7)
}
  0x12   :  { %28 = dma.hbm_to_vmem [thread:$0]  %s1009_s1, 128, %s26_s10, [#allocation3]  }
  0x13   :  { %s711_s25 = scalar_lea.hbm %s1013_s5, 2048 }
  0x14   :  { %p712_p8 = scmp.ne.s32.totalorder %s1013_s5, %s711_s25  ;;  %p715_p9 = scmp.lt.u32.totalorder %s711_s25, %s1013_s5 }
  0x16   :  { %p717_p10 = pnand %p715_p9, %p712_p8 }
  0x18   :  { %720 = shalt.err (!%p717_p10)
}
  0x19   :  { %s721_s30 = scalar_lea.vmem %s819_s12, 2048  ;;  %p726_p12 = scmp.lt.s32.totalorder %s819_s12, %s819_s12 }
  0x1a   :  { %p722_p11 = scmp.ne.s32.totalorder %s819_s12, %s721_s30  ;;  %p727_p13 = scmp.lt.s32.totalorder %s721_s30, %s721_s30 }
  0x1c   :  { %p728_p0 = por %p727_p13, %p726_p12 }
  0x1e   :  { %p729_p1 = pnand %p728_p0, %p722_p11 }
  0x20   :  { %732 = shalt.err (!%p729_p1)
}
  0x21   :  { %s763_s1 = smov 128   ;;  %s764_s10 = smov 8  }
  0x22   :  { %46 = dma.hbm_to_vmem [thread:$0]  %s1013_s5, 2048, %s819_s12, [#allocation6], %s763_s1, %s763_s1, %s764_s10  }
  0x23   :  { %755 = dma.done.wait [#allocation3], 128  }
  0x24   :  { %756 = vsyncadd [#allocation3], 4294967168 }
  0x25   :  { %757 = dma.done.wait [#allocation6], 2048  }
  0x26   :  { %758 = vsyncadd [#allocation6], 4294965248  ;;  %v765_v0 = vmov 0.0   ;;  %vm766_vm0 = vmmov 0   ;;  %v767_v1 = vmov 0.0|0.0   ;;  %vm68_vm1 = vcmask 64512  }
  0x27   :  { %499 = vmatprep.subr.mxu0 %v765_v0  ;;  %501 = vmatprep.mubr.msk.f32.mxu0 %vm766_vm0, %v765_v0  ;;  %v60_v2 = vld [vmem:[#allocation2] sm:$0xff]  ;;  %v144_v5 = vld [vmem:[%s1011_s3 + $0x8] sm:$0xff]  ;;  %v145_v6 = vld [vmem:[%s1011_s3 + $0x10] sm:$0xff]  ;;  %s768_s10 = smov [#allocation7]  }
  0x28   :  { %609 = vmatprep.subr.bf16.mxu1 %v767_v1  ;;  %536 = vmatprep.mubr.msk.f32.mxu1 %vm766_vm0, %v765_v0  ;;  %v59_v3 = vld [vmem:[%s1008_s0] sm:$0xff]  ;;  %v146_v7 = vld [vmem:[%s1011_s3 + $0x18] sm:$0xff]  ;;  %v148_v11 = vld [vmem:[%s1011_s3 + $0x28] sm:$0xff]  ;;  %s431_s11 = sshll.u32 %s768_s10, 4  ;;  %s432_s11 = int_to_ptr.vmem [resolvable:$true] %s431_s11 }
  0x29   :  { %v143_v4 = vld [vmem:[%s1011_s3] sm:$0xff]  ;;  %500 = vmatpush3.msra.mxu0 %v60_v2  ;;  %v613_v9 = vpack.c.bf16 %v146_v7, %v145_v6  ;;  %v149_v13 = vld [vmem:[%s1011_s3 + $0x30] sm:$0xff]  ;;  %v150_v14 = vld [vmem:[%s1011_s3 + $0x38] sm:$0xff]  ;;  %p738_p3 = scmp.lt.s32.totalorder %s432_s11, %s432_s11 }
  0x2a   :  { %502 = vmatmul.mubr.msk.f32.vlgmr.msra.gmra.mrb[0].mxu0 %vm68_vm1, %v59_v3  ;;  %v610_v8 = vpack.c.bf16 %v144_v5, %v143_v4  ;;  %633 = vmatprep.subr.bf16.mxu0 %v767_v1  ;;  %v147_v10 = vld [vmem:[%s1011_s3 + $0x20] sm:$0xff]  ;;  %v619_v15 = vpack.c.bf16 %v150_v14, %v149_v13  ;;  %v152_v17 = vld [vmem:[%s1011_s3 + $0x48] sm:$0xff]  ;;  %v153_v19 = vld [vmem:[%s1011_s3 + $0x50] sm:$0xff] }
  0x2b   :  { %571 = vmatprep.mubr.msk.f32.mxu0 %vm766_vm0, %v765_v0  ;;  %v616_v12 = vpack.c.bf16 %v148_v11, %v147_v10  ;;  %v151_v16 = vld [vmem:[%s1011_s3 + $0x40] sm:$0xff]  ;;  %v154_v20 = vld [vmem:[%s1011_s3 + $0x58] sm:$0xff]  ;;  %v156_v23 = vld [vmem:[%s1011_s3 + $0x68] sm:$0xff] }
  0x2c   :  { %611 = vmatpush3.bf16.msra.mxu1 %v610_v8  ;;  %v622_v18 = vpack.c.bf16 %v152_v17, %v151_v16  ;;  %v625_v21 = vpack.c.bf16 %v154_v20, %v153_v19  ;;  %v155_v22 = vld [vmem:[%s1011_s3 + $0x60] sm:$0xff]  ;;  %v157_v25 = vld [vmem:[%s1011_s3 + $0x70] sm:$0xff]  ;;  %v158_v26 = vld [vmem:[%s1011_s3 + $0x78] sm:$0xff] }
  0x2d   :  { %612 = vmatprep.subr.bf16.mxu1 %v767_v1  ;;  %v628_v24 = vpack.c.bf16 %v156_v23, %v155_v22  ;;  %v631_v27 = vpack.c.bf16 %v158_v26, %v157_v25  ;;  %v237_v28 = vld [vmem:[#allocation5] sm:$0xff]  ;;  %v238_v29 = vld [vmem:[#allocation5 + $0x8] sm:$0xff]  ;;  %v239_v30 = vld [vmem:[#allocation5 + $0x10] sm:$0xff] }
  0x2e   :  { %v634_v31 = vpack.c.bf16 %v238_v29, %v237_v28  ;;  %v240_v32 = vld [vmem:[#allocation5 + $0x18] sm:$0xff]  ;;  %v241_v34 = vld [vmem:[#allocation5 + $0x20] sm:$0xff]  ;;  %v242_v35 = vld [vmem:[#allocation5 + $0x28] sm:$0xff] }
  0x2f   :  { %v637_v33 = vpack.c.bf16 %v240_v32, %v239_v30  ;;  %v640_v36 = vpack.c.bf16 %v242_v35, %v241_v34  ;;  %v243_v37 = vld [vmem:[#allocation5 + $0x30] sm:$0xff]  ;;  %v244_v38 = vld [vmem:[#allocation5 + $0x38] sm:$0xff]  ;;  %v245_v40 = vld [vmem:[#allocation5 + $0x40] sm:$0xff] }
  0x30   :  { %614 = vmatpush3.bf16.msra.mxu1 %v613_v9  ;;  %635 = vmatpush3.bf16.msra.mxu0 %v634_v31  ;;  %v643_v39 = vpack.c.bf16 %v244_v38, %v243_v37  ;;  %v246_v41 = vld [vmem:[#allocation5 + $0x48] sm:$0xff]  ;;  %v247_v43 = vld [vmem:[#allocation5 + $0x50] sm:$0xff]  ;;  %v248_v44 = vld [vmem:[#allocation5 + $0x58] sm:$0xff] }
  0x31   :  { %615 = vmatprep.subr.bf16.mxu1 %v767_v1  ;;  %636 = vmatprep.subr.bf16.mxu0 %v767_v1  ;;  %v646_v42 = vpack.c.bf16 %v246_v41, %v245_v40  ;;  %v649_v45 = vpack.c.bf16 %v248_v44, %v247_v43  ;;  %v249_v46 = vld [vmem:[#allocation5 + $0x60] sm:$0xff]  ;;  %v250_v47 = vld [vmem:[#allocation5 + $0x68] sm:$0xff]  ;;  %v441_v49 = vld [vmem:[%s1010_s2] ss:$0 sm:$0xff] }
  0x32   :  { %v652_v48 = vpack.c.bf16 %v250_v47, %v249_v46  ;;  %v251_v54 = vld [vmem:[#allocation5 + $0x70] sm:$0xff]  ;;  %v252_v55 = vld [vmem:[#allocation5 + $0x78] sm:$0xff]  ;;  %v332_v58 = vld [vmem:[%s1015_s7 + $0x8] sm:$0xff] }
  0x33   :  { %v655_v56 = vpack.c.bf16 %v252_v55, %v251_v54  ;;  %v331_v57 = vld [vmem:[%s1015_s7] sm:$0xff]  ;;  %v333_v59 = vld [vmem:[%s1015_s7 + $0x10] sm:$0xff]  ;;  %v334_v61 = vld [vmem:[%s1015_s7 + $0x18] sm:$0xff] }
  0x34   :  { %617 = vmatpush3.bf16.msra.mxu1 %v616_v12  ;;  %638 = vmatpush3.bf16.msra.mxu0 %v637_v33  ;;  %v658_v60 = vpack.c.bf16 %v332_v58, %v331_v57  ;;  %v661_v62 = vpack.c.bf16 %v334_v61, %v333_v59  ;;  %v335_v63 = vld [vmem:[%s1015_s7 + $0x20] sm:$0xff]  ;;  %v337_v3 = vld [vmem:[%s1015_s7 + $0x30] sm:$0xff]  ;;  %v338_v4 = vld [vmem:[%s1015_s7 + $0x38] sm:$0xff] }
  0x35   :  { %618 = vmatprep.subr.bf16.mxu1 %v767_v1  ;;  %639 = vmatprep.subr.bf16.mxu0 %v767_v1  ;;  %v667_v5 = vpack.c.bf16 %v338_v4, %v337_v3  ;;  %v339_v6 = vld [vmem:[%s1015_s7 + $0x40] sm:$0xff]  ;;  %v340_v7 = vld [vmem:[%s1015_s7 + $0x48] sm:$0xff]  ;;  %v341_v9 = vld [vmem:[%s1015_s7 + $0x50] sm:$0xff] }
  0x36   :  { %v670_v8 = vpack.c.bf16 %v340_v7, %v339_v6  ;;  %v342_v10 = vld [vmem:[%s1015_s7 + $0x58] sm:$0xff]  ;;  %v343_v12 = vld [vmem:[%s1015_s7 + $0x60] sm:$0xff]  ;;  %v344_v13 = vld [vmem:[%s1015_s7 + $0x68] sm:$0xff] }
  0x37   :  { %v673_v11 = vpack.c.bf16 %v342_v10, %v341_v9  ;;  %v676_v14 = vpack.c.bf16 %v344_v13, %v343_v12  ;;  %v345_v20 = vld [vmem:[%s1015_s7 + $0x70] sm:$0xff] }
  0x38   :  { %620 = vmatpush3.bf16.msra.mxu1 %v619_v15  ;;  %641 = vmatpush3.bf16.msra.mxu0 %v640_v36  ;;  %v443_v15 = vld [vmem:[%s1012_s4] ss:$0 sm:$0xff] }
  0x39   :  { %621 = vmatprep.subr.bf16.mxu1 %v767_v1  ;;  %642 = vmatprep.subr.bf16.mxu0 %v767_v1 }
  0x3c   :  { %623 = vmatpush3.bf16.msra.mxu1 %v622_v18  ;;  %644 = vmatpush3.bf16.msra.mxu0 %v643_v39 }
  0x3d   :  { %624 = vmatprep.subr.bf16.mxu1 %v767_v1  ;;  %645 = vmatprep.subr.bf16.mxu0 %v767_v1 }
  0x40   :  { %626 = vmatpush3.bf16.msra.mxu1 %v625_v21  ;;  %647 = vmatpush3.bf16.msra.mxu0 %v646_v42  ;;  %v346_v21 = vld [vmem:[%s1015_s7 + $0x78] sm:$0xff] }
  0x41   :  { %627 = vmatprep.subr.bf16.mxu1 %v767_v1  ;;  %648 = vmatprep.subr.bf16.mxu0 %v767_v1  ;;  %v679_v22 = vpack.c.bf16 %v346_v21, %v345_v20 }
  0x44   :  { %629 = vmatpush3.bf16.msra.mxu1 %v628_v24  ;;  %650 = vmatpush3.bf16.msra.mxu0 %v649_v45 }
  0x45   :  { %630 = vmatprep.subr.bf16.mxu1 %v767_v1  ;;  %651 = vmatprep.subr.bf16.mxu0 %v767_v1 }
  0x48   :  { %632 = vmatpush3.bf16.msra.mxu1 %v631_v27  ;;  %653 = vmatpush3.bf16.msra.mxu0 %v652_v48  ;;  %v445_v27 = vld [vmem:[%s1016_s8] ss:$0 sm:$0xff] }
  0x49   :  { %657 = vmatprep.subr.bf16.mxu1 %v767_v1  ;;  %654 = vmatprep.subr.bf16.mxu0 %v767_v1 }
  0x4c   :  { %656 = vmatpush3.bf16.msra.mxu0 %v655_v56 }
  0xfd   :  { %v138_v50 = vpop.f32.mrb[0].mxu0 }
  0xfe   :  { %v139_v51 = vadd.f32 %v441_v49, %v138_v50  ;;  %v503_v52 = vpop.f32.mrb[1].mxu0 }
 0x100   :  { %v142_v53 = vmax.f32 %v139_v51, 0.0 }
 0x102   :  { %537 = vmatmul.mubr.f32.vlgmr.msra.gmra.mrb[0].mxu1 %v142_v53 }
 0x103   :  { %606 = vmatprep.mubr.msk.f32.mxu1 %vm766_vm0, %v765_v0  ;;  %659 = vmatpush3.bf16.msra.mxu1 %v658_v60  ;;  %v336_v0 = vld [vmem:[%s1015_s7 + $0x28] sm:$0xff]  ;;  %s733_s7 = scalar_lea.vmem %s432_s11, 128 }
 0x104   :  { %660 = vmatprep.subr.bf16.mxu1 %v767_v1  ;;  %v664_v2 = vpack.c.bf16 %v336_v0, %v335_v63  ;;  %p734_p2 = scmp.ne.s32.totalorder %s432_s11, %s733_s7  ;;  %p739_p4 = scmp.lt.s32.totalorder %s733_s7, %s733_s7 }
 0x106   :  { %p740_p5 = por %p739_p4, %p738_p3 }
 0x107   :  { %662 = vmatpush3.bf16.msra.mxu1 %v661_v62 }
 0x108   :  { %663 = vmatprep.subr.bf16.mxu1 %v767_v1  ;;  %p741_p6 = pnand %p740_p5, %p734_p2 }
 0x10b   :  { %665 = vmatpush3.bf16.msra.mxu1 %v664_v2 }
 0x10c   :  { %666 = vmatprep.subr.bf16.mxu1 %v767_v1 }
 0x10f   :  { %668 = vmatpush3.bf16.msra.mxu1 %v667_v5 }
 0x110   :  { %669 = vmatprep.subr.bf16.mxu1 %v767_v1 }
 0x113   :  { %671 = vmatpush3.bf16.msra.mxu1 %v670_v8 }
 0x114   :  { %672 = vmatprep.subr.bf16.mxu1 %v767_v1 }
 0x117   :  { %674 = vmatpush3.bf16.msra.mxu1 %v673_v11 }
 0x118   :  { %675 = vmatprep.subr.bf16.mxu1 %v767_v1 }
 0x11b   :  { %677 = vmatpush3.bf16.msra.mxu1 %v676_v14 }
 0x11c   :  { %678 = vmatprep.subr.bf16.mxu1 %v767_v1  ;;  %v444_v1 = vld [vmem:[%s1014_s6] ss:$0 sm:$0xff] }
 0x11f   :  { %680 = vmatpush3.bf16.msra.mxu1 %v679_v22 }
 0x1d5   :  { %v232_v16 = vpop.f32.mrb[0].mxu1 }
 0x1d6   :  { %v233_v17 = vadd.f32 %v443_v15, %v232_v16  ;;  %v538_v18 = vpop.f32.mrb[1].mxu1 }
 0x1d8   :  { %v236_v19 = vmax.f32 %v233_v17, 0.0 }
 0x1da   :  { %572 = vmatmul.mubr.f32.vlgmr.msra.gmra.mrb[2].mxu0 %v236_v19 }
 0x2ad   :  { %v326_v23 = vpop.f32.mrb[2].mxu0 }
 0x2ae   :  { %v327_v24 = vadd.f32 %v444_v1, %v326_v23  ;;  %v573_v25 = vpop.f32.mrb[3].mxu0 }
 0x2b0   :  { %v330_v26 = vmax.f32 %v327_v24, 0.0 }
 0x2b2   :  { %607 = vmatmul.mubr.f32.vlgmr.msra.gmra.mrb[2].mxu1 %v330_v26 }
 0x385   :  { %v420_v28 = vpop.f32.mrb[2].mxu1 }
 0x386   :  { %v421_v29 = vadd.f32 %v445_v27, %v420_v28  ;;  %v608_v30 = vpop.f32.mrb[3].mxu1 }
 0x388   :  { %424 = vst.msk [vmem:[#allocation7] sm:$0xff] %vm68_vm1, %v421_v29 }
 0x389   :  { %744 = shalt.err (!%p741_p6)
}
 0x38a   :  { %s745_s5 = scalar_lea.hbm %s1017_s9, 128 }
 0x38b   :  { %p746_p7 = scmp.ne.s32.totalorder %s1017_s9, %s745_s5  ;;  %p749_p8 = scmp.lt.u32.totalorder %s745_s5, %s1017_s9 }
 0x38d   :  { %p751_p9 = pnand %p749_p8, %p746_p7 }
 0x38f   :  { %754 = shalt.err (!%p751_p9)
}
 0x390   :  { %434 = dma.vmem_to_hbm [thread:$0]  %s432_s11, 128, %s1017_s9, [#allocation4]  }
 0x391   :  { %759 = dma.done.wait [#allocation4], 128  }
 0x392   :  { %760 = vsyncadd [#allocation4], 4294967168 }
 0x393   :  { %438 = vsyncpa [#allocation3], 1 }
 0x394   :  { %439 = vsyncpa [#allocation6], 1 }
 0x395   :  { %440 = vsyncpa [#allocation4], 1 }

</bundles_post_ra>
